<compile_context>
chip_gen: v5e
topology: v5e:2x2
jax: 0.10.0
libtpu: 0.0.40
codegen_flags: <defaults>
</compile_context>

<pallas_src>
import functools

import jax
import jax.numpy as jnp
from jax import lax
from jax.experimental import pallas as pl
from jax.experimental.pallas import tpu as pltpu


_SMOOTH = 1e-5
_TARGET_BLOCK_BYTES = 1 << 20   # ~1 MiB per streamed input block (~85% of HBM roofline)


def _round_up(x, m):
    return ((x + m - 1) // m) * m


def _ce_bce(logits_ref, label_ref, p2_ref, inten_ref):
    """CrossEntropyLoss(mean) + BCEWithLogitsLoss(mean) on the small resident operands."""
    logits = logits_ref[...].astype(jnp.float32)                 # (B, C)
    bsz, ncls = logits.shape
    m = jnp.max(logits, axis=-1, keepdims=True)
    lse = m + jnp.log(jnp.sum(jnp.exp(logits - m), axis=-1, keepdims=True))
    classes = lax.broadcasted_iota(jnp.int32, (bsz, ncls), 1)
    onehot = (classes == label_ref[...]).astype(jnp.float32)     # label: (B, 1) int32
    picked = jnp.sum(onehot * logits, axis=-1, keepdims=True)
    ce = jnp.mean(lse - picked)

    x = p2_ref[...].astype(jnp.float32)                          # (B, 1) logits
    z = inten_ref[...].astype(jnp.float32)                       # (B, 1) target
    bce = jnp.mean(jnp.maximum(x, 0.0) - x * z + jnp.log1p(jnp.exp(-jnp.abs(x))))
    return ce, bce


def _write_out(out_ref, intersect, denom, ce, bce):
    """Pack 4 scalars into row 0, lanes 0..3 of the lane-dense (1, 8, 128) output block."""
    srow = lax.broadcasted_iota(jnp.int32, (1, 8, 128), 1)
    lane = lax.broadcasted_iota(jnp.int32, (1, 8, 128), 2)
    first = srow == 0
    vals = jnp.where(first & (lane == 0), intersect,
           jnp.where(first & (lane == 1), denom,
           jnp.where(first & (lane == 2), ce,
           jnp.where(first & (lane == 3), bce, 0.0))))
    out_ref[...] = vals.astype(jnp.float32)


def _multitask_kernel(p0_ref, mask_ref, logits_ref, label_ref, p2_ref, inten_ref,
                      out_ref, acc_st_ref, acc_sq_ref, *,
                      single_block, sub, n_sub, row_tile, rows, steps_per_split,
                      needs_mask, unroll):
    i = pl.program_id(0)      # split index ("parallel" -> one per TensorCore on v7x)
    k = pl.program_id(1)      # streaming / reduction axis ("arbitrary")

    if single_block:
        # Whole dice reduction fits in one resident block: no scratch, no streaming.
        s = p0_ref[...].astype(jnp.float32)
        t = mask_ref[...].astype(jnp.float32)
        intersect = jnp.sum(s * t)
        denom = jnp.sum(s * s) + jnp.sum(t * t)
        ce, bce = _ce_bce(logits_ref, label_ref, p2_ref, inten_ref)
        _write_out(out_ref, intersect, denom, ce, bce)
        return

    lanes = acc_st_ref.shape[-1]

    @pl.when(k == 0)
    def _init():
        z = jnp.zeros((sub, lanes), jnp.float32)
        acc_st_ref[i] = z
        acc_sq_ref[i] = z

    row_start = (i * steps_per_split + k) * row_tile

    def body(j, carry):
        st, sq = carry
        off = pl.multiple_of(j * sub, sub)
        s = p0_ref[pl.ds(off, sub), :].astype(jnp.float32)
        t = mask_ref[pl.ds(off, sub), :].astype(jnp.float32)
        if needs_mask:
            # Mask rows past the valid extent (ragged last block / clamped overflow block).
            rid = lax.broadcasted_iota(jnp.int32, (sub, 1), 0)
            valid = (row_start + off + rid) < rows
            s = jnp.where(valid, s, 0.0)
            t = jnp.where(valid, t, 0.0)
        return st + s * t, sq + s * s + t * t

    st, sq = lax.fori_loop(0, n_sub, body, (acc_st_ref[i], acc_sq_ref[i]), unroll=unroll)
    acc_st_ref[i] = st
    acc_sq_ref[i] = sq

    @pl.when(k == steps_per_split - 1)
    def _finalize():
        intersect = jnp.sum(st)
        denom = jnp.sum(sq)
        ce, bce = _ce_bce(logits_ref, label_ref, p2_ref, inten_ref)
        _write_out(out_ref, intersect, denom, ce, bce)


def multitask_loss(preds, mask, label, intensity):
    """preds = (seg_logits NCHW, class_logits (B, C), bin_logits (B, 1));
    mask: same element count as preds[0]; label: (B,) int; intensity: (B,).
    Returns (3,) f32: [dice_loss, cross_entropy, bce_with_logits]."""
    p0, p1, p2 = preds
    B = p1.shape[0]

    n = int(p0.size)
    assert int(mask.size) == n, "seg prediction and mask must have the same number of elements"

    # ---- lane-dense slab layout with no wrapper-side copy (reshape only) ----
    lanes = next((c for c in (512, 256, 128) if n % c == 0), None)
    if lanes is None:
        # TODO(synk): n not a multiple of 128 is not expected for seg maps; this rare
        # fallback zero-pads (padding contributes 0 to all dice partial sums).
        lanes = 128
        n_eff = _round_up(n, lanes)
    else:
        n_eff = n

    def to_slab(x):
        flat = x.reshape(-1)              # native dtype; widening happens in-kernel
        if n_eff != n:
            flat = jnp.pad(flat, (0, n_eff - n))
        return flat.reshape(n_eff // lanes, lanes)

    p0_slab = to_slab(p0)
    mask_slab = to_slab(mask)
    rows = n_eff // lanes

    # Sub-tile height respecting sublane packing of the narrowest streamed dtype.
    min_itemsize = min(p0_slab.dtype.itemsize, mask_slab.dtype.itemsize, 4)
    max_itemsize = max(p0_slab.dtype.itemsize, mask_slab.dtype.itemsize)
    sub = 8 * (4 // min_itemsize)          # 8 (f32), 16 (bf16), 32 (int8/fp8)

    # ~1 MiB blocks per streamed input, multiple of `sub`.
    row_cap = max(sub, (_TARGET_BLOCK_BYTES // (lanes * max_itemsize)) // sub * sub)

    if rows <= row_cap:
        single_block = True
        row_tile, nblocks, nsplit, steps = rows, 1, 1, 1
        needs_mask, n_sub, unroll = False, 0, 1
    else:
        single_block = False
        row_tile = row_cap
        nblocks = pl.cdiv(rows, row_tile)
        nsplit = 2 if nblocks >= 2 else 1           # leading "parallel" axis -> both v7x TCs
        steps = pl.cdiv(nblocks, nsplit)
        needs_mask = (nsplit * steps * row_tile != rows)
        n_sub = row_tile // sub
        unroll = min(8, n_sub)

    need_clamp = (not single_block) and (nsplit * steps != nblocks)

    if single_block:
        def slab_map(i, k):
            return (0, 0)
    elif need_clamp:
        def slab_map(i, k):
            # Clamp overflow blocks onto the last valid block (their contribution is masked).
            return (jnp.minimum(i * steps + k, nblocks - 1), 0)
    else:
        def slab_map(i, k):
            return (i * steps + k, 0)

    logits = p1                                    # (B, C), native dtype, VMEM-resident
    label_2d = label.reshape(B, 1).astype(jnp.int32)
    p2_2d = p2.reshape(B, 1)
    inten_2d = intensity.reshape(B, 1)             # == intensity.unsqueeze(1)

    kernel = functools.partial(
        _multitask_kernel,
        single_block=single_block, sub=sub, n_sub=n_sub, row_tile=row_tile,
        rows=rows, steps_per_split=steps, needs_mask=needs_mask, unroll=unroll)

    out = pl.pallas_call(
        kernel,
        out_shape=jax.ShapeDtypeStruct((nsplit, 8, 128), jnp.float32),
        grid_spec=pltpu.PrefetchScalarGridSpec(
            num_scalar_prefetch=0,
            grid=(nsplit, steps),
            in_specs=[
                # Streamed dice operands: new ~1 MiB tile per step (double-buffered DMA).
                pl.BlockSpec((row_tile, lanes), slab_map),
                pl.BlockSpec((row_tile, lanes), slab_map),
                # Small CE/BCE operands: same block every step -> VMEM resident.
                pl.BlockSpec(logits.shape, lambda i, k: (0, 0)),
                pl.BlockSpec(label_2d.shape, lambda i, k: (0, 0)),
                pl.BlockSpec(p2_2d.shape, lambda i, k: (0, 0)),
                pl.BlockSpec(inten_2d.shape, lambda i, k: (0, 0)),
            ],
            out_specs=pl.BlockSpec((1, 8, 128), lambda i, k: (i, 0, 0)),
            scratch_shapes=[
                pltpu.VMEM((nsplit, sub, lanes), jnp.float32),   # per-split sum(s*t)
                pltpu.VMEM((nsplit, sub, lanes), jnp.float32),   # per-split sum(s^2 + t^2)
            ],
        ),
        compiler_params=pltpu.CompilerParams(
            dimension_semantics=("parallel", "arbitrary"),
        ),
        cost_estimate=pl.CostEstimate(
            flops=6 * n_eff + 20 * B,
            transcendentals=B * (logits.shape[-1] + 2),
            bytes_accessed=n_eff * (p0_slab.dtype.itemsize + mask_slab.dtype.itemsize)
            + 4 * nsplit * 8 * 128,
        ),
    )(p0_slab, mask_slab, logits, label_2d, p2_2d, inten_2d)

    # Tiny scalar epilogue: combine per-split dice partials; CE/BCE identical per split.
    parts = out[:, 0, :4].astype(jnp.float32)
    intersect = jnp.sum(parts[:, 0])
    denom = jnp.sum(parts[:, 1])
    dice = 1.0 - (2.0 * intersect + _SMOOTH) / (denom + _SMOOTH)
    return jnp.stack([dice, parts[0, 2], parts[0, 3]])


def _reference(preds, mask, label, intensity):
    """Pure-JAX reference of the same forward semantics."""
    p0, p1, p2 = preds
    s = p0.astype(jnp.float32).reshape(-1)
    t = mask.astype(jnp.float32).reshape(-1)
    intersect = jnp.sum(s * t)
    denom = jnp.sum(s * s) + jnp.sum(t * t)
    dice = 1.0 - (2.0 * intersect + _SMOOTH) / (denom + _SMOOTH)

    logits = p1.astype(jnp.float32)
    lse = jax.nn.logsumexp(logits, axis=-1)
    picked = jnp.take_along_axis(logits, label[:, None].astype(jnp.int32), axis=-1)[:, 0]
    ce = jnp.mean(lse - picked)

    x = p2.astype(jnp.float32).reshape(-1)
    z = intensity.astype(jnp.float32).reshape(-1)
    bce = jnp.mean(jnp.maximum(x, 0.0) - x * z + jnp.log1p(jnp.exp(-jnp.abs(x))))
    return jnp.stack([dice, ce, bce])


if __name__ == "__main__":
    def make_inputs(key, B, C, H, W, dtype=jnp.float32):
        k0, k1, k2, k3, k4, k5 = jax.random.split(key, 6)
        preds0 = jax.random.normal(k0, (B, 1, H, W), dtype=dtype)                 # seg logits
        msk = (jax.random.uniform(k1, (B, 1, H, W)) > 0.5).astype(dtype)          # seg target
        preds1 = jax.random.normal(k2, (B, C), dtype=dtype)                       # class logits
        lbl = jax.random.randint(k3, (B,), 0, C, dtype=jnp.int32)                 # class indices
        preds2 = jax.random.normal(k4, (B, 1), dtype=dtype)                       # intensity logits
        inten = jax.random.uniform(k5, (B,), dtype=dtype)                         # intensity target
        return (preds0, preds1, preds2), msk, lbl, inten

    key = jax.random.PRNGKey(0)
    k_small, k_big = jax.random.split(key)

    # Small case: single resident block path.
    preds, mask, label, intensity = make_inputs(k_small, B=2, C=4, H=16, W=16)
    losses = jax.block_until_ready(multitask_loss(preds, mask, label, intensity))
    ref = jax.block_until_ready(_reference(preds, mask, label, intensity))
    assert losses.shape == (3,) and losses.dtype == jnp.float32
    assert bool(jnp.allclose(losses, ref, rtol=1e-4, atol=1e-4)), (losses, ref)

    # Larger case: streamed multi-block path (ragged tail mask + 2-way core split).
    preds, mask, label, intensity = make_inputs(k_big, B=2, C=4, H=768, W=768)
    losses = jax.block_until_ready(multitask_loss(preds, mask, label, intensity))
    ref = jax.block_until_ready(_reference(preds, mask, label, intensity))
    assert losses.shape == (3,) and losses.dtype == jnp.float32
    assert bool(jnp.allclose(losses, ref, rtol=1e-4, atol=1e-4)), (losses, ref)

    print("KERNEL_OK")
</pallas_src>

<mosaic_0001>
module attributes {stable_mosaic.version = 11 : i64} {
  func.func @_multitask_kernel(%arg0: i32, %arg1: i32, %arg2: memref<1x512xf32, #tpu.memory_space<vmem>>, %arg3: memref<1x512xf32, #tpu.memory_space<vmem>>, %arg4: memref<2x4xf32, #tpu.memory_space<vmem>>, %arg5: memref<2x1xi32, #tpu.memory_space<vmem>>, %arg6: memref<2x1xf32, #tpu.memory_space<vmem>>, %arg7: memref<2x1xf32, #tpu.memory_space<vmem>>, %arg8: memref<1x8x128xf32, #tpu.memory_space<vmem>>, %arg9: memref<1x8x512xf32, #tpu.memory_space<vmem>>, %arg10: memref<1x8x512xf32, #tpu.memory_space<vmem>>) attributes {dimension_semantics = [#tpu.dimension_semantics<parallel>, #tpu.dimension_semantics<arbitrary>], iteration_bounds = array<i64: 1, 1>, scalar_prefetch = 0 : i64, scratch_operands = 2 : i64, tpu.core_type = #tpu.core_type<tc>, window_params = [{pipeline_mode = #tpu.pipeline_mode<synchronous>, transform_indices = @transform_0, window_bounds = array<i64: 1, 512>}, {pipeline_mode = #tpu.pipeline_mode<synchronous>, transform_indices = @transform_1, window_bounds = array<i64: 1, 512>}, {pipeline_mode = #tpu.pipeline_mode<synchronous>, transform_indices = @transform_2, window_bounds = array<i64: 2, 4>}, {pipeline_mode = #tpu.pipeline_mode<synchronous>, transform_indices = @transform_3, window_bounds = array<i64: 2, 1>}, {pipeline_mode = #tpu.pipeline_mode<synchronous>, transform_indices = @transform_4, window_bounds = array<i64: 2, 1>}, {pipeline_mode = #tpu.pipeline_mode<synchronous>, transform_indices = @transform_5, window_bounds = array<i64: 2, 1>}, {transform_indices = @transform_6, window_bounds = array<i64: 1, 8, 128>}]} {
    %c0 = arith.constant 0 : index
    %c0_0 = arith.constant 0 : index
    %0 = vector.load %arg2[%c0, %c0_0] : memref<1x512xf32, #tpu.memory_space<vmem>>, vector<1x512xf32>
    %c0_1 = arith.constant 0 : index
    %c0_2 = arith.constant 0 : index
    %1 = vector.load %arg3[%c0_1, %c0_2] : memref<1x512xf32, #tpu.memory_space<vmem>>, vector<1x512xf32>
    %2 = arith.mulf %0, %1 : vector<1x512xf32>
    %3 = vector.shape_cast %2 : vector<1x512xf32> to vector<1x1x512xf32>
    %cst = arith.constant dense<0.000000e+00> : vector<1xf32>
    %4 = vector.multi_reduction <add>, %3, %cst [1, 2] : vector<1x1x512xf32> to vector<1xf32>
    %5 = vector.shape_cast %4 : vector<1xf32> to vector<1x1x1xf32>
    %6 = vector.extract %5[0, 0, 0] : f32 from vector<1x1x1xf32>
    %7 = arith.mulf %0, %0 : vector<1x512xf32>
    %8 = vector.shape_cast %7 : vector<1x512xf32> to vector<1x1x512xf32>
    %cst_3 = arith.constant dense<0.000000e+00> : vector<1xf32>
    %9 = vector.multi_reduction <add>, %8, %cst_3 [1, 2] : vector<1x1x512xf32> to vector<1xf32>
    %10 = vector.shape_cast %9 : vector<1xf32> to vector<1x1x1xf32>
    %11 = vector.extract %10[0, 0, 0] : f32 from vector<1x1x1xf32>
    %12 = arith.mulf %1, %1 : vector<1x512xf32>
    %13 = vector.shape_cast %12 : vector<1x512xf32> to vector<1x1x512xf32>
    %cst_4 = arith.constant dense<0.000000e+00> : vector<1xf32>
    %14 = vector.multi_reduction <add>, %13, %cst_4 [1, 2] : vector<1x1x512xf32> to vector<1xf32>
    %15 = vector.shape_cast %14 : vector<1xf32> to vector<1x1x1xf32>
    %16 = vector.extract %15[0, 0, 0] : f32 from vector<1x1x1xf32>
    %17 = arith.addf %11, %16 : f32
    %c0_5 = arith.constant 0 : index
    %c0_6 = arith.constant 0 : index
    %18 = vector.load %arg4[%c0_5, %c0_6] : memref<2x4xf32, #tpu.memory_space<vmem>>, vector<2x4xf32>
    %cst_7 = arith.constant dense<0xFF800000> : vector<2xf32>
    %19 = vector.multi_reduction <maximumf>, %18, %cst_7 [1] : vector<2x4xf32> to vector<2xf32>
    %20 = vector.shape_cast %19 : vector<2xf32> to vector<2x1xf32>
    %21 = vector.broadcast %20 : vector<2x1xf32> to vector<2x4xf32>
    %22 = arith.subf %18, %21 : vector<2x4xf32>
    %23 = math.exp %22 : vector<2x4xf32>
    %cst_8 = arith.constant dense<0.000000e+00> : vector<2xf32>
    %24 = vector.multi_reduction <add>, %23, %cst_8 [1] : vector<2x4xf32> to vector<2xf32>
    %25 = vector.shape_cast %24 : vector<2xf32> to vector<2x1xf32>
    %26 = math.log %25 : vector<2x1xf32>
    %27 = arith.addf %20, %26 : vector<2x1xf32>
    %28 = tpu.iota {dimensions = array<i32: 1>} : vector<2x4xi32>
    %c0_9 = arith.constant 0 : index
    %c0_10 = arith.constant 0 : index
    %29 = vector.load %arg5[%c0_9, %c0_10] : memref<2x1xi32, #tpu.memory_space<vmem>>, vector<2x1xi32>
    %30 = vector.broadcast %29 : vector<2x1xi32> to vector<2x4xi32>
    %31 = arith.cmpi eq, %28, %30 : vector<2x4xi32>
    %32 = arith.extui %31 : vector<2x4xi1> to vector<2x4xi32>
    %33 = arith.sitofp %32 : vector<2x4xi32> to vector<2x4xf32>
    %34 = arith.mulf %33, %18 : vector<2x4xf32>
    %cst_11 = arith.constant dense<0.000000e+00> : vector<2xf32>
    %35 = vector.multi_reduction <add>, %34, %cst_11 [1] : vector<2x4xf32> to vector<2xf32>
    %36 = vector.shape_cast %35 : vector<2xf32> to vector<2x1xf32>
    %37 = arith.subf %27, %36 : vector<2x1xf32>
    %38 = vector.shape_cast %37 : vector<2x1xf32> to vector<1x2x1xf32>
    %cst_12 = arith.constant dense<0.000000e+00> : vector<1xf32>
    %39 = vector.multi_reduction <add>, %38, %cst_12 [1, 2] : vector<1x2x1xf32> to vector<1xf32>
    %40 = vector.shape_cast %39 : vector<1xf32> to vector<1x1x1xf32>
    %41 = vector.extract %40[0, 0, 0] : f32 from vector<1x1x1xf32>
    %cst_13 = arith.constant 2.000000e+00 : f32
    %42 = arith.divf %41, %cst_13 : f32
    %c0_14 = arith.constant 0 : index
    %c0_15 = arith.constant 0 : index
    %43 = vector.load %arg6[%c0_14, %c0_15] : memref<2x1xf32, #tpu.memory_space<vmem>>, vector<2x1xf32>
    %c0_16 = arith.constant 0 : index
    %c0_17 = arith.constant 0 : index
    %44 = vector.load %arg7[%c0_16, %c0_17] : memref<2x1xf32, #tpu.memory_space<vmem>>, vector<2x1xf32>
    %cst_18 = arith.constant 0.000000e+00 : f32
    %45 = vector.broadcast %cst_18 : f32 to vector<2x1xf32>
    %46 = arith.maximumf %43, %45 : vector<2x1xf32>
    %47 = arith.mulf %43, %44 : vector<2x1xf32>
    %48 = arith.subf %46, %47 : vector<2x1xf32>
    %49 = math.absf %43 : vector<2x1xf32>
    %cst_19 = arith.constant 0.000000e+00 : f32
    %50 = vector.broadcast %cst_19 : f32 to vector<2x1xf32>
    %51 = arith.subf %50, %49 : vector<2x1xf32>
    %52 = math.exp %51 : vector<2x1xf32>
    %53 = math.log1p %52 : vector<2x1xf32>
    %54 = arith.addf %48, %53 : vector<2x1xf32>
    %55 = vector.shape_cast %54 : vector<2x1xf32> to vector<1x2x1xf32>
    %cst_20 = arith.constant dense<0.000000e+00> : vector<1xf32>
    %56 = vector.multi_reduction <add>, %55, %cst_20 [1, 2] : vector<1x2x1xf32> to vector<1xf32>
    %57 = vector.shape_cast %56 : vector<1xf32> to vector<1x1x1xf32>
    %58 = vector.extract %57[0, 0, 0] : f32 from vector<1x1x1xf32>
    %cst_21 = arith.constant 2.000000e+00 : f32
    %59 = arith.divf %58, %cst_21 : f32
    %60 = tpu.iota {dimensions = array<i32: 1>} : vector<1x8x128xi32>
    %61 = tpu.iota {dimensions = array<i32: 2>} : vector<1x8x128xi32>
    %c0_i32 = arith.constant 0 : i32
    %62 = vector.broadcast %c0_i32 : i32 to vector<1x8x128xi32>
    %63 = arith.cmpi eq, %60, %62 : vector<1x8x128xi32>
    %c0_i32_22 = arith.constant 0 : i32
    %64 = vector.broadcast %c0_i32_22 : i32 to vector<1x8x128xi32>
    %65 = arith.cmpi eq, %61, %64 : vector<1x8x128xi32>
    %66 = arith.andi %63, %65 : vector<1x8x128xi1>
    %c1_i32 = arith.constant 1 : i32
    %67 = vector.broadcast %c1_i32 : i32 to vector<1x8x128xi32>
    %68 = arith.cmpi eq, %61, %67 : vector<1x8x128xi32>
    %69 = arith.andi %63, %68 : vector<1x8x128xi1>
    %c2_i32 = arith.constant 2 : i32
    %70 = vector.broadcast %c2_i32 : i32 to vector<1x8x128xi32>
    %71 = arith.cmpi eq, %61, %70 : vector<1x8x128xi32>
    %72 = arith.andi %63, %71 : vector<1x8x128xi1>
    %c3_i32 = arith.constant 3 : i32
    %73 = vector.broadcast %c3_i32 : i32 to vector<1x8x128xi32>
    %74 = arith.cmpi eq, %61, %73 : vector<1x8x128xi32>
    %75 = arith.andi %63, %74 : vector<1x8x128xi1>
    %cst_23 = arith.constant 0.000000e+00 : f32
    %76 = vector.broadcast %59 : f32 to vector<1x8x128xf32>
    %77 = vector.broadcast %cst_23 : f32 to vector<1x8x128xf32>
    %78 = arith.select %75, %76, %77 : vector<1x8x128xi1>, vector<1x8x128xf32>
    %79 = vector.broadcast %42 : f32 to vector<1x8x128xf32>
    %80 = arith.select %72, %79, %78 : vector<1x8x128xi1>, vector<1x8x128xf32>
    %81 = vector.broadcast %17 : f32 to vector<1x8x128xf32>
    %82 = arith.select %69, %81, %80 : vector<1x8x128xi1>, vector<1x8x128xf32>
    %83 = vector.broadcast %6 : f32 to vector<1x8x128xf32>
    %84 = arith.select %66, %83, %82 : vector<1x8x128xi1>, vector<1x8x128xf32>
    %c0_24 = arith.constant 0 : index
    %c0_25 = arith.constant 0 : index
    %c0_26 = arith.constant 0 : index
    %85 = vector.load %arg8[%c0_24, %c0_25, %c0_26] : memref<1x8x128xf32, #tpu.memory_space<vmem>>, vector<1x8x128xf32>
    tpu.vector_store %arg8[%c0_24, %c0_25, %c0_26], %84 {strides = array<i32>} : memref<1x8x128xf32, #tpu.memory_space<vmem>>, vector<1x8x128xf32>,
    return
  }
  func.func @transform_0(%arg0: i32, %arg1: i32) -> (i32, i32) {
    %c0_i32 = arith.constant 0 : i32
    %c0_i32_0 = arith.constant 0 : i32
    %c0_i32_1 = arith.constant 0 : i32
    return %c0_i32, %c0_i32_0 : i32, i32
  }
  func.func @transform_1(%arg0: i32, %arg1: i32) -> (i32, i32) {
    %c0_i32 = arith.constant 0 : i32
    %c0_i32_0 = arith.constant 0 : i32
    %c0_i32_1 = arith.constant 0 : i32
    return %c0_i32, %c0_i32_0 : i32, i32
  }
  func.func @transform_2(%arg0: i32, %arg1: i32) -> (i32, i32) {
    %c0_i32 = arith.constant 0 : i32
    %c0_i32_0 = arith.constant 0 : i32
    %c0_i32_1 = arith.constant 0 : i32
    return %c0_i32, %c0_i32_0 : i32, i32
  }
  func.func @transform_3(%arg0: i32, %arg1: i32) -> (i32, i32) {
    %c0_i32 = arith.constant 0 : i32
    %c0_i32_0 = arith.constant 0 : i32
    %c0_i32_1 = arith.constant 0 : i32
    return %c0_i32, %c0_i32_0 : i32, i32
  }
  func.func @transform_4(%arg0: i32, %arg1: i32) -> (i32, i32) {
    %c0_i32 = arith.constant 0 : i32
    %c0_i32_0 = arith.constant 0 : i32
    %c0_i32_1 = arith.constant 0 : i32
    return %c0_i32, %c0_i32_0 : i32, i32
  }
  func.func @transform_5(%arg0: i32, %arg1: i32) -> (i32, i32) {
    %c0_i32 = arith.constant 0 : i32
    %c0_i32_0 = arith.constant 0 : i32
    %c0_i32_1 = arith.constant 0 : i32
    return %c0_i32, %c0_i32_0 : i32, i32
  }
  func.func @transform_6(%arg0: i32, %arg1: i32) -> (i32, i32, i32) {
    %c0_i32 = arith.constant 0 : i32
    %c0_i32_0 = arith.constant 0 : i32
    %c0_i32_1 = arith.constant 0 : i32
    return %arg0, %c0_i32, %c0_i32_0 : i32, i32, i32
  }
}

</mosaic_0001>

<bundles_post_ra>
// kernel: tpu_custom_call.1
= control target key start
LH: loop header
LB: loop body
LE: loop exit
PB: predicated region body
PF: predicated region fallthrough
CT: control target
= control target key end

     0   :  { %vm107_vm0 = vcmask 25600   ;;  %v282_v2 = vmov 0   ;;  %s377_s0 = inlined_call_operand.vmem [shape: f32[1,512], index: 0, kind: input, shape index: {}]   ;;  %s378_s1 = inlined_call_operand.vmem [shape: f32[1,512], index: 1, kind: input, shape index: {}]   ;;  %s379_s2 = inlined_call_operand.vmem [shape: f32[2,4], index: 2, kind: input, shape index: {}]   ;;  %s380_s3 = inlined_call_operand.vmem [shape: s32[2,1], index: 3, kind: input, shape index: {}]   ;;  %s381_s4 = inlined_call_operand.vmem [shape: f32[2,1], index: 4, kind: input, shape index: {}]   ;;  %s382_s5 = inlined_call_operand.vmem [shape: f32[2,1], index: 5, kind: input, shape index: {}]   ;;  %s383_s6 = inlined_call_operand.hbm [shape: f32[1,8,128], index: 6, kind: output, shape index: {}]  }
   0x1   :  { %v106_v0 = vld [vmem:[%s379_s2] sm:$0x3]  ;;  %245 = vset.pattern.permute.xlu0 %v282_v2 }
   0x2   :  { %v108_v1 = vsel %vm107_vm0, %v106_v0, -inf }
   0x3   :  { %11 = vsyncpa [#allocation5], 0  ;;  %109 = vmax.xlane.f32.xlu0 %v108_v1  ;;  %v122_v3 = vld [vmem:[%s380_s3] sm:$0x3]  ;;  %vm36_vm1 = vcmask 1040384   ;;  %v120_v23 = vlaneseq  ;;  %v283_v26 = vmov 0.0  }
   0x4   :  { %v24_v4 = vld [vmem:[%s377_s0] sm:$0xf]  ;;  %vm134_vm4 = vcmask 1024   ;;  %s285_s12 = smov [#allocation4]   ;;  %s219_s16 = sshll.u32 %s383_s6, 4  ;;  %s220_s16 = int_to_ptr.hbm [resolvable:$true] %s219_s16 }
   0x5   :  { %v25_v5 = vld [vmem:[%s378_s1] sm:$0xf]  ;;  %v343_v24 = vand.u32 127, %v120_v23  ;;  %v53_v35 = vmul.f32 %v24_v4, %v24_v4  ;;  %s217_s13 = sshll.u32 %s285_s12, 4  ;;  %s218_s13 = int_to_ptr.vmem [resolvable:$true] %s217_s13 }
   0x6   :  { %v26_v6 = vmul.f32 %v25_v5, %v24_v4  ;;  %v154_v30 = vld [vmem:[%s381_s4] sm:$0x3]  ;;  %v79_v34 = vmul.f32 %v25_v5, %v25_v5 }
   0x7   :  { %v159_v31 = vand.u32 2147483647, %v154_v30  ;;  %v55_v38 = vperm.slane %v53_v35, 0  ;;  %v56_v39 = vperm.slane %v53_v35, 1  ;;  %v57_v44 = vperm.slane %v53_v35, 2 }
   0x8   :  { %v28_v7 = vperm.slane %v26_v6, 0  ;;  %v29_v8 = vperm.slane %v26_v6, 1  ;;  %v30_v9 = vperm.slane %v26_v6, 2  ;;  %v31_v10 = vperm.slane %v26_v6, 3  ;;  %v155_v61 = vld [vmem:[%s382_s5] sm:$0x3] }
   0x9   :  { %v160_v32 = vsub.f32 0.0, %v159_v31  ;;  %v81_v36 = vperm.slane %v79_v34, 0  ;;  %v82_v37 = vperm.slane %v79_v34, 1  ;;  %v83_v41 = vperm.slane %v79_v34, 2 }
   0xa   :  { %v37_v11 = vsel %vm36_vm1, %v28_v7, 0.0  ;;  %v38_v12 = vsel %vm36_vm1, %v29_v8, 0.0  ;;  %v40_v13 = vsel %vm36_vm1, %v30_v9, 0.0  ;;  %v42_v16 = vsel %vm36_vm1, %v31_v10, 0.0 }
   0xb   :  { %v39_v14 = vadd.f32 %v38_v12, %v37_v11  ;;  %v161_v33 = vmul.f32 1.442695, %v160_v32  ;;  %v89_v42 = vsel %vm36_vm1, %v81_v36, 0.0  ;;  %v90_v43 = vsel %vm36_vm1, %v82_v37, 0.0 }
   0xc   :  { %v91_v45 = vadd.f32 %v90_v43, %v89_v42  ;;  %v63_v46 = vsel %vm36_vm1, %v55_v38, 0.0  ;;  %v64_v47 = vsel %vm36_vm1, %v56_v39, 0.0  ;;  %v84_v49 = vperm.slane %v79_v34, 3 }
   0xd   :  { %v41_v18 = vadd.f32 %v40_v13, %v39_v14  ;;  %v92_v50 = vsel %vm36_vm1, %v83_v41, 0.0  ;;  %v58_v51 = vperm.slane %v53_v35, 3  ;;  %v65_v52 = vadd.f32 %v64_v47, %v63_v46 }
   0xe   :  { %v93_v53 = vadd.f32 %v92_v50, %v91_v45  ;;  %v66_v54 = vsel %vm36_vm1, %v57_v44, 0.0  ;;  %v94_v55 = vsel %vm36_vm1, %v84_v49, 0.0  ;;  %v156_v63 = vmax.f32 %v154_v30, 0.0 }
   0xf   :  { %v43_v20 = vadd.f32 %v42_v16, %v41_v18  ;;  %v67_v56 = vadd.f32 %v66_v54, %v65_v52  ;;  %v68_v57 = vsel %vm36_vm1, %v58_v51, 0.0  ;;  %v284_v39 = vmov 2.0  }
  0x10   :  { %v95_v58 = vadd.f32 %v94_v55, %v93_v53  ;;  %vm201_vm7 = vcmp.eq.s32.totalorder %v343_v24, 3  ;;  %vm199_vm8 = vcmp.eq.s32.totalorder %v343_v24, 2  ;;  %vm197_vm9 = vcmp.eq.s32.totalorder %v343_v24, 1 }
  0x11   :  { %44 = vadd.xlane.f32.xlu2 %v43_v20  ;;  %v69_v60 = vadd.f32 %v68_v57, %v67_v56  ;;  %vm195_vm11 = vcmp.eq.s32.totalorder %v343_v24, 0 }
  0x17   :  { %124 = vperm.xlu0 %245, %v122_v3  }
  0x19   :  { %70 = vadd.xlane.f32.xlu2 %v69_v60  ;;  %v193_v60 = vshrl.u32 %v120_v23, 7 }
  0x1b   :  { %vm194_vm6 = vcmp.eq.s32.totalorder %v193_v60, 0 }
  0x1c   :  { %vm202_vm10 = vmand %vm194_vm6, %vm201_vm7 }
  0x1d   :  { %vm200_vm12 = vmand %vm194_vm6, %vm199_vm8 }
  0x1e   :  { %vm198_vm13 = vmand %vm194_vm6, %vm197_vm9 }
  0x1f   :  { %vm196_vm14 = vmand %vm194_vm6, %vm195_vm11 }
  0x76   :  { %v337_v15 = vpop.xlane.xlu0 %109 }
  0x77   :  { %v111_v17 = vsub.f32 %v106_v0, %v337_v15 }
  0x79   :  { %v112_v19 = vmul.f32 1.442695, %v111_v17 }
  0x7b   :  { %246 = vpow2.f32 %v112_v19 }
  0x7c   :  { %248 = vpow2.f32 %v161_v33 }
  0x81   :  { %v247_v21 = vpop.eup %246 }
  0x82   :  { %v114_v22 = vsel %vm107_vm0, %v247_v21, 0.0  ;;  %v249_v40 = vpop.eup %248 }
  0x83   :  { %115 = vadd.xlane.f32.xlu1 %v114_v22  ;;  %v163_v48 = vadd.f32 1.0, %v249_v40  ;;  %v166_v59 = vmul.f32 -0.5, %v249_v40  ;;  %v169_v1 = vand.u32 2147483647, %v249_v40 }
  0x84   :  { %v45_v17 = vpop.xlane.xlu2 %44 }
  0x85   :  { %250 = vlog2.f32 %v163_v48  ;;  %v167_v62 = vadd.f32 1.0, %v166_v59  ;;  %vm170_vm3 = vcmp.lt.f32.partialorder %v169_v1, 0.0004427343  ;;  %v46_v18 = vrot.slane %v45_v17, 4 }
  0x87   :  { %v168_v3 = vmul.f32 %v249_v40, %v167_v62  ;;  %v47_v19 = vadd.f32 %v46_v18, %v45_v17 }
  0x89   :  { %v125_v25 = vpop.permute.xlu0 %124  ;;  %v48_v20 = vrot.slane %v47_v19, 2 }
  0x8a   :  { %vm126_vm2 = vcmp.eq.s32.totalorder %v343_v24, %v125_v25 }
  0x8b   :  { %v228_v27 = vsel %vm126_vm2, 1.0, %v283_v26  ;;  %v251_v2 = vpop.eup %250  ;;  %v49_v21 = vadd.f32 %v48_v20, %v47_v19 }
  0x8c   :  { %v129_v28 = vmul.f32 %v228_v27, %v106_v0  ;;  %v157_v0 = vmul.f32 %v155_v61, %v154_v30  ;;  %v165_v5 = vmul.f32 0.6931472, %v251_v2 }
  0x8d   :  { %v50_v22 = vrot.slane %v49_v21, 1 }
  0x8e   :  { %v130_v29 = vsel %vm107_vm0, %v129_v28, 0.0  ;;  %v158_v4 = vsub.f32 %v156_v63, %v157_v0  ;;  %v171_v6 = vsel %vm170_vm3, %v168_v3, %v165_v5  ;;  %v71_v28 = vpop.xlane.xlu2 %70 }
  0x8f   :  { %131 = vadd.xlane.f32.xlu1 %v130_v29  ;;  %v51_v25 = vadd.f32 %v50_v22, %v49_v21  ;;  %v72_v29 = vrot.slane %v71_v28, 4 }
  0x90   :  { %v172_v7 = vadd.f32 %v171_v6, %v158_v4 }
  0x91   :  { %229 = vpush %v51_v25  ;;  %v73_v31 = vadd.f32 %v72_v29, %v71_v28 }
  0x92   :  { %v173_v8 = vsel %vm134_vm4, %v172_v7, 0.0 }
  0x97   :  { %96 = vadd.xlane.f32.xlu1 %v95_v58 }
  0x9f   :  { %174 = vadd.xlane.f32.xlu1 %v173_v8 }
  0xc2   :  { %s362_s4 = spop %229 }
  0xc3   :  { %v209_v1 = vstv %s362_s4 }
  0xf6   :  { %v116_v9 = vpop.xlane.xlu1 %115 }
  0xf7   :  { %252 = vlog2.f32 %v116_v9 }
  0xf8   :  { %254 = vrcp.f32 %v284_v39 }
  0xfd   :  { %v253_v10 = vpop.eup %252 }
  0xfe   :  { %v118_v11 = vmul.f32 0.6931472, %v253_v10  ;;  %v255_v41 = vpop.eup %254 }
  0xff   :  { %v146_v43 = vmul.f32 2.0, %v255_v41  ;;  %vm150_vm5 = vweird.f32 %v255_v41 }
 0x100   :  { %v119_v12 = vadd.f32 %v118_v11, %v337_v15  ;;  %v74_v15 = vrot.slane %v73_v31, 2 }
 0x101   :  { %v147_v45 = vsub.f32 1.0, %v146_v43 }
 0x102   :  { %v132_v13 = vpop.xlane.xlu1 %131  ;;  %v75_v34 = vadd.f32 %v74_v15, %v73_v31 }
 0x103   :  { %v133_v14 = vsub.f32 %v119_v12, %v132_v13  ;;  %v148_v50 = vmul.f32 %v255_v41, %v147_v45 }
 0x104   :  { %v76_v36 = vrot.slane %v75_v34, 1 }
 0x105   :  { %v135_v16 = vsel %vm134_vm4, %v133_v14, 0.0  ;;  %v149_v54 = vadd.f32 %v255_v41, %v148_v50 }
 0x106   :  { %136 = vadd.xlane.f32.xlu2 %v135_v16  ;;  %v77_v38 = vadd.f32 %v76_v36, %v75_v34 }
 0x107   :  { %v151_v58 = vsel %vm150_vm5, %v255_v41, %v149_v54 }
 0x108   :  { %231 = vpush %v77_v38 }
 0x10a   :  { %v97_v26 = vpop.xlane.xlu1 %96 }
 0x10b   :  { %v98_v27 = vrot.slane %v97_v26, 4 }
 0x10d   :  { %v99_v30 = vadd.f32 %v98_v27, %v97_v26 }
 0x10f   :  { %v100_v32 = vrot.slane %v99_v30, 2 }
 0x111   :  { %v101_v33 = vadd.f32 %v100_v32, %v99_v30 }
 0x112   :  { %v175_v40 = vpop.xlane.xlu1 %174 }
 0x113   :  { %v102_v35 = vrot.slane %v101_v33, 1  ;;  %v176_v42 = vrot.slane %v175_v40, 4 }
 0x115   :  { %v103_v37 = vadd.f32 %v102_v35, %v101_v33  ;;  %v177_v44 = vadd.f32 %v176_v42, %v175_v40 }
 0x117   :  { %233 = vpush %v103_v37  ;;  %v178_v47 = vrot.slane %v177_v44, 2 }
 0x119   :  { %v179_v51 = vadd.f32 %v178_v47, %v177_v44 }
 0x11b   :  { %v180_v56 = vrot.slane %v179_v51, 1 }
 0x11d   :  { %v181_v59 = vadd.f32 %v180_v56, %v179_v51 }
 0x139   :  { %s232_s5 = spop %231 }
 0x148   :  { %s234_s29 = spop %233 }
 0x149   :  { %s105_s10 = sadd.f32 %s234_s29, %s232_s5 }
 0x14b   :  { %v207_v63 = vstv %s105_s10 }
 0x179   :  { %v137_v46 = vpop.xlane.xlu2 %136 }
 0x17a   :  { %v138_v48 = vrot.slane %v137_v46, 4 }
 0x17c   :  { %v139_v49 = vadd.f32 %v138_v48, %v137_v46 }
 0x17e   :  { %v140_v52 = vrot.slane %v139_v49, 2 }
 0x180   :  { %v141_v53 = vadd.f32 %v140_v52, %v139_v49 }
 0x182   :  { %v142_v55 = vrot.slane %v141_v53, 1 }
 0x184   :  { %v143_v57 = vadd.f32 %v142_v55, %v141_v53 }
 0x186   :  { %235 = vpush %v143_v57 }
 0x187   :  { %237 = vpush %v151_v58 }
 0x188   :  { %239 = vpush %v181_v59 }
 0x1b7   :  { %s236_s30 = spop %235 }
 0x1b8   :  { %s238_s7 = spop %237 }
 0x1b9   :  { %s153_s8 = smul.f32 %s238_s7, %s236_s30  ;;  %s240_s9 = spop %239 }
 0x1ba   :  { %s191_s11 = smul.f32 %s240_s9, %s238_s7 }
 0x1bb   :  { %v205_v23 = vstv %s153_s8 }
 0x1bc   :  { %v203_v61 = vstv %s191_s11 }
 0x1bd   :  { %v204_v62 = vsel %vm202_vm10, %v203_v61, 0.0 }
 0x1be   :  { %v206_v0 = vsel %vm200_vm12, %v205_v23, %v204_v62 }
 0x1bf   :  { %v208_v2 = vsel %vm198_vm13, %v207_v63, %v206_v0 }
 0x1c0   :  { %v210_v24 = vsel %vm196_vm14, %v209_v1, %v208_v2 }
 0x1c1   :  { %211 = vst [vmem:[#allocation4] sm:$0xff] %v210_v24 }
 0x1c2   :  { %222 = dma.vmem_to_hbm [thread:$0]  %s218_s13, 128, %s220_s16, [#allocation5]  }
 0x1c3   :  { %280 = dma.done.wait [#allocation5], 128  }
 0x1c4   :  { %281 = vsyncadd [#allocation5], 4294967168 }
 0x1c5   :  { %227 = vsyncpa [#allocation5], 1 }

</bundles_post_ra>
